<compile_context>
chip_gen: v7x
topology: tpu7x:2x2x1
jax: 0.10.0
libtpu: 0.0.40
codegen_flags: <defaults>
</compile_context>

<pallas_src>
import functools

import jax
import jax.numpy as jnp
from jax.experimental import pallas as pl
from jax.experimental.pallas import tpu as pltpu


_SMALL_BYTES = 1 << 20    # below this, pallas_call fixed cost dominates the copy
_LARGE_BYTES = 64 << 20   # above this, use the chunked multi-DMA path


# ---------------------------------------------------------------------------
# Pallas kernels (pure HBM->HBM DMA; no VMEM/vreg/MXU involvement)
# ---------------------------------------------------------------------------

def _whole_copy_kernel(x_hbm, o_hbm, sem):
    # Single whole-slab DMA: no HBM->VMEM->vreg->VMEM->HBM round trip.
    cp = pltpu.make_async_copy(x_hbm, o_hbm, sem)
    cp.start()
    cp.wait()


def _chunked_copy_kernel(x_hbm, o_hbm, sems, *, n_inflight, rows_per_dma):
    # Each grid step copies n_inflight * rows_per_dma leading-dim rows,
    # keeping n_inflight DMAs in flight (start all, then wait all).
    step = pl.program_id(0)
    rows_per_step = n_inflight * rows_per_dma
    base = step * rows_per_step
    for d in range(n_inflight):
        r0 = base + d * rows_per_dma
        pltpu.make_async_copy(
            x_hbm.at[pl.ds(r0, rows_per_dma)],
            o_hbm.at[pl.ds(r0, rows_per_dma)],
            sems.at[d],
        ).start()
    for d in range(n_inflight):
        r0 = base + d * rows_per_dma
        pltpu.make_async_copy(
            x_hbm.at[pl.ds(r0, rows_per_dma)],
            o_hbm.at[pl.ds(r0, rows_per_dma)],
            sems.at[d],
        ).wait()


# ---------------------------------------------------------------------------
# pallas_call wrappers
# ---------------------------------------------------------------------------

def _clone_whole_pallas(x: jnp.ndarray) -> jnp.ndarray:
    nbytes = x.size * x.dtype.itemsize
    return pl.pallas_call(
        _whole_copy_kernel,
        out_shape=jax.ShapeDtypeStruct(x.shape, x.dtype),
        in_specs=[pl.BlockSpec(memory_space=pl.ANY)],   # raw HBM ref, no auto-DMA
        out_specs=pl.BlockSpec(memory_space=pl.ANY),
        scratch_shapes=[pltpu.SemaphoreType.DMA(())],
        cost_estimate=pl.CostEstimate(
            flops=0, transcendentals=0, bytes_accessed=2 * nbytes),
    )(x)


def _clone_chunked_pallas(x: jnp.ndarray, n_steps: int, n_inflight: int,
                          rows_per_dma: int) -> jnp.ndarray:
    nbytes = x.size * x.dtype.itemsize
    kernel = functools.partial(
        _chunked_copy_kernel, n_inflight=n_inflight, rows_per_dma=rows_per_dma)
    return pl.pallas_call(
        kernel,
        out_shape=jax.ShapeDtypeStruct(x.shape, x.dtype),
        grid=(n_steps,),
        in_specs=[pl.BlockSpec(memory_space=pl.ANY)],
        out_specs=pl.BlockSpec(memory_space=pl.ANY),
        scratch_shapes=[pltpu.SemaphoreType.DMA((n_inflight,))],
        compiler_params=pltpu.CompilerParams(
            dimension_semantics=("parallel",)),   # shards steps across TCs on v7x
        cost_estimate=pl.CostEstimate(
            flops=0, transcendentals=0, bytes_accessed=2 * nbytes),
    )(x)


def _pick_chunking(rows: int, nbytes: int):
    """Heuristic chunking for very large tensors; None -> whole-slab copy."""
    if nbytes < _LARGE_BYTES or rows < 2:
        return None
    for n_steps, n_inflight in ((8, 4), (4, 4), (4, 2), (2, 2)):
        n_dmas = n_steps * n_inflight
        if rows % n_dmas == 0:
            return n_steps, n_inflight, rows // n_dmas
    return None


def _materialized_clone(x: jnp.ndarray) -> jnp.ndarray:
    """Physically distinct copy of x (PyTorch .clone()), size-dispatched."""
    nbytes = x.size * x.dtype.itemsize
    if nbytes < _SMALL_BYTES:
        # Copy time at HBM roofline is ns; pallas_call dispatch is us. Let XLA copy.
        return jnp.copy(x)
    rows = x.shape[0] if x.ndim >= 1 else 1
    chunking = _pick_chunking(rows, nbytes)
    if chunking is not None:
        return _clone_chunked_pallas(x, *chunking)
    return _clone_whole_pallas(x)


# ---------------------------------------------------------------------------
# Public ops (custom VJP mirrors PushToInfFunction.backward exactly)
# ---------------------------------------------------------------------------

@jax.custom_vjp
def push_to_inf(x: jnp.ndarray) -> jnp.ndarray:
    """PushToInf forward. JAX arrays are immutable, so `.clone()` == identity."""
    return x


def _pti_fwd(x):
    return x, None


def _pti_bwd(_, g):
    # Matches PushToInfFunction.backward: grad_input = -ones_like(grad_output),
    # independent of the incoming cotangent (intentional; do not "fix").
    return (-jnp.ones_like(g),)


push_to_inf.defvjp(_pti_fwd, _pti_bwd)


@jax.custom_vjp
def push_to_inf_clone(x: jnp.ndarray) -> jnp.ndarray:
    """PushToInf forward with a physically distinct output buffer."""
    return _materialized_clone(x)


def _ptic_fwd(x):
    return _materialized_clone(x), None


def _ptic_bwd(_, g):
    return (-jnp.ones_like(g),)


push_to_inf_clone.defvjp(_ptic_fwd, _ptic_bwd)


# ---------------------------------------------------------------------------
# Demo / validation
# ---------------------------------------------------------------------------

if __name__ == "__main__":
    key = jax.random.PRNGKey(0)
    # NCHW input, small shape consistent with typical Loci usage.
    x = jax.random.normal(key, (2, 4, 16, 16), dtype=jnp.float32)

    # 1) Run the whole-slab Pallas clone kernel once and validate exact identity.
    y_pallas = jax.block_until_ready(_clone_whole_pallas(x))
    assert y_pallas.shape == x.shape and y_pallas.dtype == x.dtype
    assert bool(jnp.all(y_pallas == x))

    # 2) Validate the chunked multi-DMA kernel on a small, cleanly divisible shape.
    x2 = jax.random.normal(jax.random.PRNGKey(0), (8, 4, 16, 16), dtype=jnp.float32)
    y2 = jax.block_until_ready(
        _clone_chunked_pallas(x2, n_steps=2, n_inflight=2, rows_per_dma=2))
    assert y2.shape == x2.shape and y2.dtype == x2.dtype
    assert bool(jnp.all(y2 == x2))

    # 3) Public op: identity primal, quirky backward == -1 everywhere.
    y = jax.block_until_ready(push_to_inf(x))
    assert y.shape == x.shape and y.dtype == x.dtype
    assert bool(jnp.all(y == x))
    g = jax.block_until_ready(jax.grad(lambda t: jnp.sum(push_to_inf(t)))(x))
    assert g.shape == x.shape
    assert bool(jnp.all(g == -1.0))

    # 4) Materializing variant: same values, same backward.
    yc = jax.block_until_ready(push_to_inf_clone(x))
    assert bool(jnp.all(yc == x))
    gc = jax.block_until_ready(jax.grad(lambda t: jnp.sum(push_to_inf_clone(t)))(x))
    assert bool(jnp.all(gc == -1.0))

    print("KERNEL_OK")
</pallas_src>

<mosaic_0001>
module attributes {stable_mosaic.version = 11 : i64} {
  func.func @_whole_copy_kernel(%arg0: memref<2x4x16x16xf32, #tpu.memory_space<any>>, %arg1: memref<2x4x16x16xf32, #tpu.memory_space<any>>, %arg2: memref<!tpu.dma_semaphore, #tpu.memory_space<semaphore_mem>>) attributes {dimension_semantics = [], scalar_prefetch = 0 : i64, scratch_operands = 1 : i64, tpu.core_type = #tpu.core_type<tc>} {
    tpu.enqueue_dma source(%arg0 : memref<2x4x16x16xf32, #tpu.memory_space<any>>) target(%arg1 : memref<2x4x16x16xf32, #tpu.memory_space<any>>) target_semaphore(%arg2 : memref<!tpu.dma_semaphore, #tpu.memory_space<semaphore_mem>>)
    tpu.wait_dma2 semaphore(%arg2 : memref<!tpu.dma_semaphore, #tpu.memory_space<semaphore_mem>>) src(%arg0 : memref<2x4x16x16xf32, #tpu.memory_space<any>>) dst(%arg1 : memref<2x4x16x16xf32, #tpu.memory_space<any>>)
    return
  }
}

</mosaic_0001>

<bundles_post_ra>
// kernel: tpu_custom_call.1
= control target key start
LH: loop header
LB: loop body
LE: loop exit
PB: predicated region body
PF: predicated region fallthrough
CT: control target
= control target key end

     0   :  { %s36_s6 = smov [#allocation2]   ;;  %s37_s7 = smov [#allocation3]   ;;  %s55_s0 = inlined_call_operand.hbm [shape: f32[2,4,16,16], index: 0, kind: input, shape index: {}]   ;;  %s56_s1 = inlined_call_operand.hbm [shape: f32[2,4,16,16], index: 1, kind: output, shape index: {}]  }
   0x1   :  { %s38_s8 = smov 0  }
   0x2   :  { %18 = dma.general %s55_s0, 2048, %s56_s1, %s36_s6, %s37_s7, [#allocation4], %s38_s8, 0  }
   0x3   :  { %34 = dma.done.wait [#allocation2], 2048 }
   0x4   :  { %35 = vsyncadd [#allocation2], 4294965248 }
   0x5   :  { %24 = vsyncmov [#allocation2] }
   0x8   :  { %s25_s13 = vpop.sfrf %24 }
   0x9   :  { %p30_p0 = scmp.ne.s32.totalorder %s25_s13, 0 }
   0xb   :  { %29 = shalt.err (%p30_p0)  }

</bundles_post_ra>
